<compile_context>
chip_gen: v6e
topology: v6e:2x2x1
jax: 0.10.0
libtpu: 0.0.40
codegen_flags: <defaults>
</compile_context>

<pallas_src>
import functools
import math

import jax
import jax.numpy as jnp
from jax.experimental import pallas as pl
from jax.experimental.pallas import tpu as pltpu


def _layer_norm(x, gamma, beta, eps):
    # PyTorch LayerNorm: biased variance over the last dim (f32 math).
    mean = jnp.mean(x, axis=-1, keepdims=True)
    var = jnp.mean((x - mean) ** 2, axis=-1, keepdims=True)
    return (x - mean) * jax.lax.rsqrt(var + eps) * gamma + beta


def _activation(x, kind):
    if kind == "relu":
        return jnp.maximum(x, 0.0)
    # exact erf-based GELU, matching the F.gelu default used by
    # nn.TransformerEncoderLayer(activation="gelu").
    # TODO(synk): tanh-approx GELU moves this to the EUP slot (free under the
    # MXU) if bit-parity with F.gelu is not required.
    return 0.5 * x * (1.0 + jax.lax.erf(x * (1.0 / math.sqrt(2.0))))


def fused_encoder_kernel(x_ref,
                         wqkv_ref, bqkv_ref, wo_ref, bo_ref,
                         g1_ref, bt1_ref,
                         w1_ref, b1_ref, w2_ref, b2_ref,
                         g2_ref, bt2_ref,
                         o_ref,
                         *, batch, seq, num_heads, eps, activation):
    """One grid step == one TransformerEncoderLayer over a (batch*seq, D) slab.

    grid = (num_batch_tiles, num_layers); the f32 activation is carried across
    the inner ("arbitrary") layer axis inside the resident output block.
    """
    layer = pl.program_id(1)

    @pl.when(layer == 0)
    def _():
        o_ref[...] = x_ref[...].astype(jnp.float32)

    x = o_ref[...]                         # (M, D) f32 activation carry
    M, D = x.shape
    hd = D // num_heads
    scale = 1.0 / math.sqrt(hd)

    # ---- fused QKV projection: one lane-dense (D, 3D) matmul ---------------
    xb = x.astype(jnp.bfloat16)            # bf16 feeds the MXU, accumulate f32
    qkv = jnp.dot(xb, wqkv_ref[...], preferred_element_type=jnp.float32)
    qkv = (qkv + bqkv_ref[...]).astype(jnp.bfloat16)   # single cast for all heads
    wo = wo_ref[...]                       # (D, D) bf16; rows = concat head dims

    # ---- multi-head self attention ------------------------------------------
    # TODO(synk): for large num_heads switch to lax.fori_loop over heads
    # (bounds vreg live ranges); for long sequences add a key-tiled
    # online-softmax inner loop instead of materializing (B, S, S) scores.
    attn = jnp.zeros((M, D), jnp.float32)
    for h in range(num_heads):             # static unroll (H is small)
        qh = qkv[:, h * hd:(h + 1) * hd].reshape(batch, seq, hd)
        kh = qkv[:, D + h * hd:D + (h + 1) * hd].reshape(batch, seq, hd)
        vh = qkv[:, 2 * D + h * hd:2 * D + (h + 1) * hd].reshape(batch, seq, hd)
        s = jnp.einsum("bqd,bkd->bqk", qh, kh,
                       preferred_element_type=jnp.float32) * scale
        s = s - jnp.max(s, axis=-1, keepdims=True)
        p = jnp.exp(s)
        p = p * pl.reciprocal(jnp.sum(p, axis=-1, keepdims=True), approx=True)
        ctx = jnp.einsum("bqk,bkd->bqd", p.astype(jnp.bfloat16), vh,
                         preferred_element_type=jnp.float32)
        # concat_h(ctx_h) @ Wo  ==  sum_h ctx_h @ Wo[h*hd:(h+1)*hd]   (exact)
        attn = attn + jnp.dot(ctx.reshape(M, hd).astype(jnp.bfloat16),
                              wo[h * hd:(h + 1) * hd, :],
                              preferred_element_type=jnp.float32)
    attn = attn + bo_ref[...]

    # dropout -> identity (eval mode); post-norm residual
    x1 = _layer_norm(x + attn, g1_ref[...], bt1_ref[...], eps)

    # ---- feed forward --------------------------------------------------------
    h1 = jnp.dot(x1.astype(jnp.bfloat16), w1_ref[...],
                 preferred_element_type=jnp.float32) + b1_ref[...]
    h1 = _activation(h1, activation)
    ff = jnp.dot(h1.astype(jnp.bfloat16), w2_ref[...],
                 preferred_element_type=jnp.float32) + b2_ref[...]
    x2 = _layer_norm(x1 + ff, g2_ref[...], bt2_ref[...], eps)

    o_ref[...] = x2                        # carry; HBM write-back only at end


_PARAM_ORDER = ("wqkv", "bqkv", "wo", "bo", "g1", "bt1",
                "w1", "b1", "w2", "b2", "g2", "bt2")


def init_yeast_transformer_params(key, num_layers, hidden_dim, num_heads):
    """Deterministic synthetic parameters, stacked along a leading layer axis.

    Lane-dense layouts (last dim >= D).  Mapping from nn.TransformerEncoderLayer:
      wqkv = in_proj_weight.T          (D, 3D), columns [Q | K | V], head-major
      bqkv = in_proj_bias[None, :]     (1, 3D)
      wo   = self_attn.out_proj.weight.T   (D, D)
      w1/w2 = linear1/linear2.weight.T
    Matmul weights are bf16 (MXU operands); biases / LN params stay f32.
    """
    del num_heads  # head split is implicit in the column ordering
    L, D = num_layers, hidden_dim
    F = 4 * D
    ks = jax.random.split(key, 4)

    def w(k, shape):
        return (0.02 * jax.random.normal(k, shape, jnp.float32)).astype(jnp.bfloat16)

    return {
        "wqkv": w(ks[0], (L, D, 3 * D)),
        "wo": w(ks[1], (L, D, D)),
        "w1": w(ks[2], (L, D, F)),
        "w2": w(ks[3], (L, F, D)),
        "bqkv": jnp.zeros((L, 1, 3 * D), jnp.float32),
        "bo": jnp.zeros((L, 1, D), jnp.float32),
        "b1": jnp.zeros((L, 1, F), jnp.float32),
        "b2": jnp.zeros((L, 1, D), jnp.float32),
        "g1": jnp.ones((L, 1, D), jnp.float32),
        "bt1": jnp.zeros((L, 1, D), jnp.float32),
        "g2": jnp.ones((L, 1, D), jnp.float32),
        "bt2": jnp.zeros((L, 1, D), jnp.float32),
    }


def yeast_transformer_forward(x, params, *, num_heads, eps, activation,
                              batch_tile=None):
    B, S, D = x.shape
    L = params["wqkv"].shape[0]
    F = params["w1"].shape[-1]
    H = num_heads
    hd = D // H

    if batch_tile is None:
        batch_tile = B
    assert B % batch_tile == 0
    nbt = B // batch_tile
    M = B * S
    tm = batch_tile * S

    x2d = x.reshape(M, D).astype(jnp.float32)
    plist = [params[name] for name in _PARAM_ORDER]

    def _wspec(arr):
        n = arr.ndim - 1
        # Squeeze the layer dim; block index follows the layer grid axis.
        return pl.BlockSpec((None,) + arr.shape[1:],
                            lambda bt, l, _n=n: (l,) + (0,) * _n)

    kernel = functools.partial(
        fused_encoder_kernel, batch=batch_tile, seq=S, num_heads=H, eps=eps,
        activation=activation)

    # Advisory cost estimate for XLA scheduling around the custom call.
    flops = L * (2 * M * D * (3 * D)        # fused qkv projection
                 + 4 * B * H * S * S * hd   # scores + context
                 + 2 * M * D * D            # output projection
                 + 4 * M * D * F)           # FFN
    transcendentals = L * (B * H * S * S + M * F)
    weight_bytes = sum(int(p.size) * p.dtype.itemsize for p in plist)
    bytes_accessed = int(weight_bytes + 2 * M * D * 4)

    out = pl.pallas_call(
        kernel,
        out_shape=jax.ShapeDtypeStruct((M, D), jnp.float32),
        grid_spec=pltpu.PrefetchScalarGridSpec(
            num_scalar_prefetch=0,
            grid=(nbt, L),
            # TODO(synk): pipeline_mode=pl.Buffered(1) on the x/out specs would
            # shave 2x(tm, D) of VMEM (their block index is constant across the
            # layer axis); left at default buffering for lowering safety.
            in_specs=[pl.BlockSpec((tm, D), lambda bt, l: (bt, 0))]
                     + [_wspec(p) for p in plist],
            out_specs=pl.BlockSpec((tm, D), lambda bt, l: (bt, 0)),
        ),
        compiler_params=pltpu.CompilerParams(
            # Batch-tile axis is independent (v7x 2-TC / megacore sharding);
            # the layer axis carries the activation -> must stay "arbitrary".
            # Default scoped-VMEM limit (32 MiB) is ample at these shapes.
            # TODO(synk): re-derive vmem_limit_bytes and tile the FFN F dim
            # for realistic D/F on v7x (64 MiB physical VMEM).
            dimension_semantics=("parallel", "arbitrary")),
        cost_estimate=pl.CostEstimate(
            flops=int(flops), transcendentals=int(transcendentals),
            bytes_accessed=bytes_accessed),
    )(x2d, *plist)
    return out.reshape(B, S, D).astype(x.dtype)


if __name__ == "__main__":
    config = {
        "num_layers": 2,
        "num_heads": 4,
        "hidden_dim": 32,
        "dropout": 0.1,          # identity in eval mode
        "activation": "gelu",
        "layer_norm_eps": 1e-5,
    }
    B, S, D = 2, 8, config["hidden_dim"]

    key = jax.random.PRNGKey(0)
    kx, kp = jax.random.split(key)
    x = jax.random.normal(kx, (B, S, D), jnp.float32)
    params = init_yeast_transformer_params(
        kp, config["num_layers"], D, config["num_heads"])

    out = yeast_transformer_forward(
        x, params,
        num_heads=config["num_heads"],
        eps=config["layer_norm_eps"],
        activation=config["activation"],
        batch_tile=1,   # exercises the "parallel" batch-tile grid axis
    )
    out = jax.block_until_ready(out)
    assert out.shape == (B, S, D)
    assert bool(jnp.all(jnp.isfinite(out)))
    print("KERNEL_OK")
</pallas_src>

<mosaic_0001>
module attributes {stable_mosaic.version = 11 : i64} {
  func.func @fused_encoder_kernel(%arg0: i32, %arg1: i32, %arg2: memref<8x32xf32, #tpu.memory_space<vmem>>, %arg3: memref<1x32x96xbf16, #tpu.memory_space<vmem>>, %arg4: memref<1x1x96xf32, #tpu.memory_space<vmem>>, %arg5: memref<1x32x32xbf16, #tpu.memory_space<vmem>>, %arg6: memref<1x1x32xf32, #tpu.memory_space<vmem>>, %arg7: memref<1x1x32xf32, #tpu.memory_space<vmem>>, %arg8: memref<1x1x32xf32, #tpu.memory_space<vmem>>, %arg9: memref<1x32x128xbf16, #tpu.memory_space<vmem>>, %arg10: memref<1x1x128xf32, #tpu.memory_space<vmem>>, %arg11: memref<1x128x32xbf16, #tpu.memory_space<vmem>>, %arg12: memref<1x1x32xf32, #tpu.memory_space<vmem>>, %arg13: memref<1x1x32xf32, #tpu.memory_space<vmem>>, %arg14: memref<1x1x32xf32, #tpu.memory_space<vmem>>, %arg15: memref<8x32xf32, #tpu.memory_space<vmem>>) attributes {dimension_semantics = [#tpu.dimension_semantics<parallel>, #tpu.dimension_semantics<arbitrary>], iteration_bounds = array<i64: 2, 2>, scalar_prefetch = 0 : i64, scratch_operands = 0 : i64, tpu.core_type = #tpu.core_type<tc>, window_params = [{transform_indices = @transform_0, window_bounds = array<i64: 8, 32>}, {transform_indices = @transform_1, window_bounds = array<i64: 1, 32, 96>}, {transform_indices = @transform_2, window_bounds = array<i64: 1, 1, 96>}, {transform_indices = @transform_3, window_bounds = array<i64: 1, 32, 32>}, {transform_indices = @transform_4, window_bounds = array<i64: 1, 1, 32>}, {transform_indices = @transform_5, window_bounds = array<i64: 1, 1, 32>}, {transform_indices = @transform_6, window_bounds = array<i64: 1, 1, 32>}, {transform_indices = @transform_7, window_bounds = array<i64: 1, 32, 128>}, {transform_indices = @transform_8, window_bounds = array<i64: 1, 1, 128>}, {transform_indices = @transform_9, window_bounds = array<i64: 1, 128, 32>}, {transform_indices = @transform_10, window_bounds = array<i64: 1, 1, 32>}, {transform_indices = @transform_11, window_bounds = array<i64: 1, 1, 32>}, {transform_indices = @transform_12, window_bounds = array<i64: 1, 1, 32>}, {transform_indices = @transform_13, window_bounds = array<i64: 8, 32>}]} {
    %c0_i32 = arith.constant 0 : i32
    %0 = arith.cmpi eq, %arg1, %c0_i32 : i32
    %1 = arith.extui %0 : i1 to i32
    %c0_i32_0 = arith.constant 0 : i32
    %2 = arith.cmpi ne, %1, %c0_i32_0 : i32
    scf.if %2 {
      %c0_80 = arith.constant 0 : index
      %c0_81 = arith.constant 0 : index
      %203 = vector.load %arg2[%c0_80, %c0_81] : memref<8x32xf32, #tpu.memory_space<vmem>>, vector<8x32xf32>
      %c0_82 = arith.constant 0 : index
      %c0_83 = arith.constant 0 : index
      %204 = vector.load %arg15[%c0_82, %c0_83] : memref<8x32xf32, #tpu.memory_space<vmem>>, vector<8x32xf32>
      tpu.vector_store %arg15[%c0_82, %c0_83], %203 {strides = array<i32>} : memref<8x32xf32, #tpu.memory_space<vmem>>, vector<8x32xf32>,
    } else {
    }
    %c0 = arith.constant 0 : index
    %c0_1 = arith.constant 0 : index
    %3 = vector.load %arg15[%c0, %c0_1] : memref<8x32xf32, #tpu.memory_space<vmem>>, vector<8x32xf32>
    %4 = arith.truncf %3 : vector<8x32xf32> to vector<8x32xbf16>
    %c0_2 = arith.constant 0 : index
    %c0_3 = arith.constant 0 : index
    %c0_4 = arith.constant 0 : index
    %5 = vector.load %arg3[%c0_2, %c0_3, %c0_4] : memref<1x32x96xbf16, #tpu.memory_space<vmem>>, vector<1x32x96xbf16>
    %6 = vector.shape_cast %5 : vector<1x32x96xbf16> to vector<32x96xbf16>
    %cst = arith.constant dense<0.000000e+00> : vector<8x96xf32>
    %7 = tpu.matmul %4, %6, %cst {dimension_numbers = #tpu.dot_dimension_numbers<[1], [0], [0], [1], [0, 0, 1, 1], [], []>} : vector<8x32xbf16>, vector<32x96xbf16>, vector<8x96xf32> -> vector<8x96xf32>
    %c0_5 = arith.constant 0 : index
    %c0_6 = arith.constant 0 : index
    %c0_7 = arith.constant 0 : index
    %8 = vector.load %arg4[%c0_5, %c0_6, %c0_7] : memref<1x1x96xf32, #tpu.memory_space<vmem>>, vector<1x1x96xf32>
    %9 = vector.shape_cast %8 : vector<1x1x96xf32> to vector<1x96xf32>
    %10 = vector.broadcast %9 : vector<1x96xf32> to vector<8x96xf32>
    %11 = arith.addf %7, %10 : vector<8x96xf32>
    %12 = arith.truncf %11 : vector<8x96xf32> to vector<8x96xbf16>
    %c0_8 = arith.constant 0 : index
    %c0_9 = arith.constant 0 : index
    %c0_10 = arith.constant 0 : index
    %13 = vector.load %arg5[%c0_8, %c0_9, %c0_10] : memref<1x32x32xbf16, #tpu.memory_space<vmem>>, vector<1x32x32xbf16>
    %14 = vector.shape_cast %13 : vector<1x32x32xbf16> to vector<32x32xbf16>
    %cst_11 = arith.constant 0.000000e+00 : f32
    %15 = vector.broadcast %cst_11 : f32 to vector<8x32xf32>
    %16 = vector.extract_strided_slice %12 {offsets = [0, 0], sizes = [8, 8], strides = [1, 1]} : vector<8x96xbf16> to vector<8x8xbf16>
    %17 = vector.shape_cast %16 : vector<8x8xbf16> to vector<1x8x8xbf16>
    %18 = vector.extract_strided_slice %12 {offsets = [0, 32], sizes = [8, 8], strides = [1, 1]} : vector<8x96xbf16> to vector<8x8xbf16>
    %19 = vector.shape_cast %18 : vector<8x8xbf16> to vector<1x8x8xbf16>
    %20 = vector.extract_strided_slice %12 {offsets = [0, 64], sizes = [8, 8], strides = [1, 1]} : vector<8x96xbf16> to vector<8x8xbf16>
    %21 = vector.shape_cast %20 : vector<8x8xbf16> to vector<1x8x8xbf16>
    "tpu.trace_start"() <{level = 10 : i32, message = "bqd,bkd->bqk"}> : () -> ()
    %cst_12 = arith.constant dense<0.000000e+00> : vector<1x8x8xf32>
    %22 = tpu.matmul %17, %19, %cst_12 {dimension_numbers = #tpu.dot_dimension_numbers<[2], [2], [1], [1], [0, 0, 0, 1, 1, 1], [0], [0]>} : vector<1x8x8xbf16>, vector<1x8x8xbf16>, vector<1x8x8xf32> -> vector<1x8x8xf32>
    "tpu.trace_stop"() : () -> ()
    %cst_13 = arith.constant 0.353553385 : f32
    %23 = vector.broadcast %cst_13 : f32 to vector<1x8x8xf32>
    %24 = arith.mulf %22, %23 : vector<1x8x8xf32>
    %cst_14 = arith.constant dense<0xFF800000> : vector<1x8xf32>
    %25 = vector.multi_reduction <maximumf>, %24, %cst_14 [2] : vector<1x8x8xf32> to vector<1x8xf32>
    %26 = vector.shape_cast %25 : vector<1x8xf32> to vector<1x8x1xf32>
    %27 = vector.broadcast %26 : vector<1x8x1xf32> to vector<1x8x8xf32>
    %28 = arith.subf %24, %27 : vector<1x8x8xf32>
    %29 = math.exp %28 : vector<1x8x8xf32>
    %cst_15 = arith.constant dense<0.000000e+00> : vector<1x8xf32>
    %30 = vector.multi_reduction <add>, %29, %cst_15 [2] : vector<1x8x8xf32> to vector<1x8xf32>
    %31 = vector.shape_cast %30 : vector<1x8xf32> to vector<1x8x1xf32>
    %32 = tpu.reciprocal %31 {approx = true} : vector<1x8x1xf32> -> vector<1x8x1xf32>
    %33 = vector.broadcast %32 : vector<1x8x1xf32> to vector<1x8x8xf32>
    %34 = arith.mulf %29, %33 : vector<1x8x8xf32>
    %35 = arith.truncf %34 : vector<1x8x8xf32> to vector<1x8x8xbf16>
    "tpu.trace_start"() <{level = 10 : i32, message = "bqk,bkd->bqd"}> : () -> ()
    %cst_16 = arith.constant dense<0.000000e+00> : vector<1x8x8xf32>
    %36 = tpu.matmul %35, %21, %cst_16 {dimension_numbers = #tpu.dot_dimension_numbers<[2], [1], [1], [2], [0, 0, 0, 1, 1, 2], [0], [0]>} : vector<1x8x8xbf16>, vector<1x8x8xbf16>, vector<1x8x8xf32> -> vector<1x8x8xf32>
    "tpu.trace_stop"() : () -> ()
    %37 = vector.shape_cast %36 : vector<1x8x8xf32> to vector<8x8xf32>
    %38 = arith.truncf %37 : vector<8x8xf32> to vector<8x8xbf16>
    %39 = vector.extract_strided_slice %14 {offsets = [0, 0], sizes = [8, 32], strides = [1, 1]} : vector<32x32xbf16> to vector<8x32xbf16>
    %cst_17 = arith.constant dense<0.000000e+00> : vector<8x32xf32>
    %40 = tpu.matmul %38, %39, %cst_17 {dimension_numbers = #tpu.dot_dimension_numbers<[1], [0], [0], [1], [0, 0, 1, 1], [], []>} : vector<8x8xbf16>, vector<8x32xbf16>, vector<8x32xf32> -> vector<8x32xf32>
    %41 = arith.addf %15, %40 : vector<8x32xf32>
    %42 = vector.extract_strided_slice %12 {offsets = [0, 8], sizes = [8, 8], strides = [1, 1]} : vector<8x96xbf16> to vector<8x8xbf16>
    %43 = vector.shape_cast %42 : vector<8x8xbf16> to vector<1x8x8xbf16>
    %44 = vector.extract_strided_slice %12 {offsets = [0, 40], sizes = [8, 8], strides = [1, 1]} : vector<8x96xbf16> to vector<8x8xbf16>
    %45 = vector.shape_cast %44 : vector<8x8xbf16> to vector<1x8x8xbf16>
    %46 = vector.extract_strided_slice %12 {offsets = [0, 72], sizes = [8, 8], strides = [1, 1]} : vector<8x96xbf16> to vector<8x8xbf16>
    %47 = vector.shape_cast %46 : vector<8x8xbf16> to vector<1x8x8xbf16>
    "tpu.trace_start"() <{level = 10 : i32, message = "bqd,bkd->bqk"}> : () -> ()
    %cst_18 = arith.constant dense<0.000000e+00> : vector<1x8x8xf32>
    %48 = tpu.matmul %43, %45, %cst_18 {dimension_numbers = #tpu.dot_dimension_numbers<[2], [2], [1], [1], [0, 0, 0, 1, 1, 1], [0], [0]>} : vector<1x8x8xbf16>, vector<1x8x8xbf16>, vector<1x8x8xf32> -> vector<1x8x8xf32>
    "tpu.trace_stop"() : () -> ()
    %cst_19 = arith.constant 0.353553385 : f32
    %49 = vector.broadcast %cst_19 : f32 to vector<1x8x8xf32>
    %50 = arith.mulf %48, %49 : vector<1x8x8xf32>
    %cst_20 = arith.constant dense<0xFF800000> : vector<1x8xf32>
    %51 = vector.multi_reduction <maximumf>, %50, %cst_20 [2] : vector<1x8x8xf32> to vector<1x8xf32>
    %52 = vector.shape_cast %51 : vector<1x8xf32> to vector<1x8x1xf32>
    %53 = vector.broadcast %52 : vector<1x8x1xf32> to vector<1x8x8xf32>
    %54 = arith.subf %50, %53 : vector<1x8x8xf32>
    %55 = math.exp %54 : vector<1x8x8xf32>
    %cst_21 = arith.constant dense<0.000000e+00> : vector<1x8xf32>
    %56 = vector.multi_reduction <add>, %55, %cst_21 [2] : vector<1x8x8xf32> to vector<1x8xf32>
    %57 = vector.shape_cast %56 : vector<1x8xf32> to vector<1x8x1xf32>
    %58 = tpu.reciprocal %57 {approx = true} : vector<1x8x1xf32> -> vector<1x8x1xf32>
    %59 = vector.broadcast %58 : vector<1x8x1xf32> to vector<1x8x8xf32>
    %60 = arith.mulf %55, %59 : vector<1x8x8xf32>
    %61 = arith.truncf %60 : vector<1x8x8xf32> to vector<1x8x8xbf16>
    "tpu.trace_start"() <{level = 10 : i32, message = "bqk,bkd->bqd"}> : () -> ()
    %cst_22 = arith.constant dense<0.000000e+00> : vector<1x8x8xf32>
    %62 = tpu.matmul %61, %47, %cst_22 {dimension_numbers = #tpu.dot_dimension_numbers<[2], [1], [1], [2], [0, 0, 0, 1, 1, 2], [0], [0]>} : vector<1x8x8xbf16>, vector<1x8x8xbf16>, vector<1x8x8xf32> -> vector<1x8x8xf32>
    "tpu.trace_stop"() : () -> ()
    %63 = vector.shape_cast %62 : vector<1x8x8xf32> to vector<8x8xf32>
    %64 = arith.truncf %63 : vector<8x8xf32> to vector<8x8xbf16>
    %65 = vector.extract_strided_slice %14 {offsets = [8, 0], sizes = [8, 32], strides = [1, 1]} : vector<32x32xbf16> to vector<8x32xbf16>
    %cst_23 = arith.constant dense<0.000000e+00> : vector<8x32xf32>
    %66 = tpu.matmul %64, %65, %cst_23 {dimension_numbers = #tpu.dot_dimension_numbers<[1], [0], [0], [1], [0, 0, 1, 1], [], []>} : vector<8x8xbf16>, vector<8x32xbf16>, vector<8x32xf32> -> vector<8x32xf32>
    %67 = arith.addf %41, %66 : vector<8x32xf32>
    %68 = vector.extract_strided_slice %12 {offsets = [0, 16], sizes = [8, 8], strides = [1, 1]} : vector<8x96xbf16> to vector<8x8xbf16>
    %69 = vector.shape_cast %68 : vector<8x8xbf16> to vector<1x8x8xbf16>
    %70 = vector.extract_strided_slice %12 {offsets = [0, 48], sizes = [8, 8], strides = [1, 1]} : vector<8x96xbf16> to vector<8x8xbf16>
    %71 = vector.shape_cast %70 : vector<8x8xbf16> to vector<1x8x8xbf16>
    %72 = vector.extract_strided_slice %12 {offsets = [0, 80], sizes = [8, 8], strides = [1, 1]} : vector<8x96xbf16> to vector<8x8xbf16>
    %73 = vector.shape_cast %72 : vector<8x8xbf16> to vector<1x8x8xbf16>
    "tpu.trace_start"() <{level = 10 : i32, message = "bqd,bkd->bqk"}> : () -> ()
    %cst_24 = arith.constant dense<0.000000e+00> : vector<1x8x8xf32>
    %74 = tpu.matmul %69, %71, %cst_24 {dimension_numbers = #tpu.dot_dimension_numbers<[2], [2], [1], [1], [0, 0, 0, 1, 1, 1], [0], [0]>} : vector<1x8x8xbf16>, vector<1x8x8xbf16>, vector<1x8x8xf32> -> vector<1x8x8xf32>
    "tpu.trace_stop"() : () -> ()
    %cst_25 = arith.constant 0.353553385 : f32
    %75 = vector.broadcast %cst_25 : f32 to vector<1x8x8xf32>
    %76 = arith.mulf %74, %75 : vector<1x8x8xf32>
    %cst_26 = arith.constant dense<0xFF800000> : vector<1x8xf32>
    %77 = vector.multi_reduction <maximumf>, %76, %cst_26 [2] : vector<1x8x8xf32> to vector<1x8xf32>
    %78 = vector.shape_cast %77 : vector<1x8xf32> to vector<1x8x1xf32>
    %79 = vector.broadcast %78 : vector<1x8x1xf32> to vector<1x8x8xf32>
    %80 = arith.subf %76, %79 : vector<1x8x8xf32>
    %81 = math.exp %80 : vector<1x8x8xf32>
    %cst_27 = arith.constant dense<0.000000e+00> : vector<1x8xf32>
    %82 = vector.multi_reduction <add>, %81, %cst_27 [2] : vector<1x8x8xf32> to vector<1x8xf32>
    %83 = vector.shape_cast %82 : vector<1x8xf32> to vector<1x8x1xf32>
    %84 = tpu.reciprocal %83 {approx = true} : vector<1x8x1xf32> -> vector<1x8x1xf32>
    %85 = vector.broadcast %84 : vector<1x8x1xf32> to vector<1x8x8xf32>
    %86 = arith.mulf %81, %85 : vector<1x8x8xf32>
    %87 = arith.truncf %86 : vector<1x8x8xf32> to vector<1x8x8xbf16>
    "tpu.trace_start"() <{level = 10 : i32, message = "bqk,bkd->bqd"}> : () -> ()
    %cst_28 = arith.constant dense<0.000000e+00> : vector<1x8x8xf32>
    %88 = tpu.matmul %87, %73, %cst_28 {dimension_numbers = #tpu.dot_dimension_numbers<[2], [1], [1], [2], [0, 0, 0, 1, 1, 2], [0], [0]>} : vector<1x8x8xbf16>, vector<1x8x8xbf16>, vector<1x8x8xf32> -> vector<1x8x8xf32>
    "tpu.trace_stop"() : () -> ()
    %89 = vector.shape_cast %88 : vector<1x8x8xf32> to vector<8x8xf32>
    %90 = arith.truncf %89 : vector<8x8xf32> to vector<8x8xbf16>
    %91 = vector.extract_strided_slice %14 {offsets = [16, 0], sizes = [8, 32], strides = [1, 1]} : vector<32x32xbf16> to vector<8x32xbf16>
    %cst_29 = arith.constant dense<0.000000e+00> : vector<8x32xf32>
    %92 = tpu.matmul %90, %91, %cst_29 {dimension_numbers = #tpu.dot_dimension_numbers<[1], [0], [0], [1], [0, 0, 1, 1], [], []>} : vector<8x8xbf16>, vector<8x32xbf16>, vector<8x32xf32> -> vector<8x32xf32>
    %93 = arith.addf %67, %92 : vector<8x32xf32>
    %94 = vector.extract_strided_slice %12 {offsets = [0, 24], sizes = [8, 8], strides = [1, 1]} : vector<8x96xbf16> to vector<8x8xbf16>
    %95 = vector.shape_cast %94 : vector<8x8xbf16> to vector<1x8x8xbf16>
    %96 = vector.extract_strided_slice %12 {offsets = [0, 56], sizes = [8, 8], strides = [1, 1]} : vector<8x96xbf16> to vector<8x8xbf16>
    %97 = vector.shape_cast %96 : vector<8x8xbf16> to vector<1x8x8xbf16>
    %98 = vector.extract_strided_slice %12 {offsets = [0, 88], sizes = [8, 8], strides = [1, 1]} : vector<8x96xbf16> to vector<8x8xbf16>
    %99 = vector.shape_cast %98 : vector<8x8xbf16> to vector<1x8x8xbf16>
    "tpu.trace_start"() <{level = 10 : i32, message = "bqd,bkd->bqk"}> : () -> ()
    %cst_30 = arith.constant dense<0.000000e+00> : vector<1x8x8xf32>
    %100 = tpu.matmul %95, %97, %cst_30 {dimension_numbers = #tpu.dot_dimension_numbers<[2], [2], [1], [1], [0, 0, 0, 1, 1, 1], [0], [0]>} : vector<1x8x8xbf16>, vector<1x8x8xbf16>, vector<1x8x8xf32> -> vector<1x8x8xf32>
    "tpu.trace_stop"() : () -> ()
    %cst_31 = arith.constant 0.353553385 : f32
    %101 = vector.broadcast %cst_31 : f32 to vector<1x8x8xf32>
    %102 = arith.mulf %100, %101 : vector<1x8x8xf32>
    %cst_32 = arith.constant dense<0xFF800000> : vector<1x8xf32>
    %103 = vector.multi_reduction <maximumf>, %102, %cst_32 [2] : vector<1x8x8xf32> to vector<1x8xf32>
    %104 = vector.shape_cast %103 : vector<1x8xf32> to vector<1x8x1xf32>
    %105 = vector.broadcast %104 : vector<1x8x1xf32> to vector<1x8x8xf32>
    %106 = arith.subf %102, %105 : vector<1x8x8xf32>
    %107 = math.exp %106 : vector<1x8x8xf32>
    %cst_33 = arith.constant dense<0.000000e+00> : vector<1x8xf32>
    %108 = vector.multi_reduction <add>, %107, %cst_33 [2] : vector<1x8x8xf32> to vector<1x8xf32>
    %109 = vector.shape_cast %108 : vector<1x8xf32> to vector<1x8x1xf32>
    %110 = tpu.reciprocal %109 {approx = true} : vector<1x8x1xf32> -> vector<1x8x1xf32>
    %111 = vector.broadcast %110 : vector<1x8x1xf32> to vector<1x8x8xf32>
    %112 = arith.mulf %107, %111 : vector<1x8x8xf32>
    %113 = arith.truncf %112 : vector<1x8x8xf32> to vector<1x8x8xbf16>
    "tpu.trace_start"() <{level = 10 : i32, message = "bqk,bkd->bqd"}> : () -> ()
    %cst_34 = arith.constant dense<0.000000e+00> : vector<1x8x8xf32>
    %114 = tpu.matmul %113, %99, %cst_34 {dimension_numbers = #tpu.dot_dimension_numbers<[2], [1], [1], [2], [0, 0, 0, 1, 1, 2], [0], [0]>} : vector<1x8x8xbf16>, vector<1x8x8xbf16>, vector<1x8x8xf32> -> vector<1x8x8xf32>
    "tpu.trace_stop"() : () -> ()
    %115 = vector.shape_cast %114 : vector<1x8x8xf32> to vector<8x8xf32>
    %116 = arith.truncf %115 : vector<8x8xf32> to vector<8x8xbf16>
    %117 = vector.extract_strided_slice %14 {offsets = [24, 0], sizes = [8, 32], strides = [1, 1]} : vector<32x32xbf16> to vector<8x32xbf16>
    %cst_35 = arith.constant dense<0.000000e+00> : vector<8x32xf32>
    %118 = tpu.matmul %116, %117, %cst_35 {dimension_numbers = #tpu.dot_dimension_numbers<[1], [0], [0], [1], [0, 0, 1, 1], [], []>} : vector<8x8xbf16>, vector<8x32xbf16>, vector<8x32xf32> -> vector<8x32xf32>
    %119 = arith.addf %93, %118 : vector<8x32xf32>
    %c0_36 = arith.constant 0 : index
    %c0_37 = arith.constant 0 : index
    %c0_38 = arith.constant 0 : index
    %120 = vector.load %arg6[%c0_36, %c0_37, %c0_38] : memref<1x1x32xf32, #tpu.memory_space<vmem>>, vector<1x1x32xf32>
    %121 = vector.shape_cast %120 : vector<1x1x32xf32> to vector<1x32xf32>
    %122 = vector.broadcast %121 : vector<1x32xf32> to vector<8x32xf32>
    %123 = arith.addf %119, %122 : vector<8x32xf32>
    %124 = arith.addf %3, %123 : vector<8x32xf32>
    %c0_39 = arith.constant 0 : index
    %c0_40 = arith.constant 0 : index
    %c0_41 = arith.constant 0 : index
    %125 = vector.load %arg7[%c0_39, %c0_40, %c0_41] : memref<1x1x32xf32, #tpu.memory_space<vmem>>, vector<1x1x32xf32>
    %126 = vector.shape_cast %125 : vector<1x1x32xf32> to vector<1x32xf32>
    %c0_42 = arith.constant 0 : index
    %c0_43 = arith.constant 0 : index
    %c0_44 = arith.constant 0 : index
    %127 = vector.load %arg8[%c0_42, %c0_43, %c0_44] : memref<1x1x32xf32, #tpu.memory_space<vmem>>, vector<1x1x32xf32>
    %128 = vector.shape_cast %127 : vector<1x1x32xf32> to vector<1x32xf32>
    %cst_45 = arith.constant dense<0.000000e+00> : vector<8xf32>
    %129 = vector.multi_reduction <add>, %124, %cst_45 [1] : vector<8x32xf32> to vector<8xf32>
    %130 = vector.shape_cast %129 : vector<8xf32> to vector<8x1xf32>
    %cst_46 = arith.constant 3.200000e+01 : f32
    %131 = vector.broadcast %cst_46 : f32 to vector<8x1xf32>
    %132 = arith.divf %130, %131 : vector<8x1xf32>
    %133 = vector.broadcast %132 : vector<8x1xf32> to vector<8x32xf32>
    %134 = arith.subf %124, %133 : vector<8x32xf32>
    %135 = arith.mulf %134, %134 : vector<8x32xf32>
    %cst_47 = arith.constant dense<0.000000e+00> : vector<8xf32>
    %136 = vector.multi_reduction <add>, %135, %cst_47 [1] : vector<8x32xf32> to vector<8xf32>
    %137 = vector.shape_cast %136 : vector<8xf32> to vector<8x1xf32>
    %cst_48 = arith.constant 3.200000e+01 : f32
    %138 = vector.broadcast %cst_48 : f32 to vector<8x1xf32>
    %139 = arith.divf %137, %138 : vector<8x1xf32>
    %140 = vector.broadcast %132 : vector<8x1xf32> to vector<8x32xf32>
    %141 = arith.subf %124, %140 : vector<8x32xf32>
    %cst_49 = arith.constant 9.99999974E-6 : f32
    %142 = vector.broadcast %cst_49 : f32 to vector<8x1xf32>
    %143 = arith.addf %139, %142 : vector<8x1xf32>
    %144 = math.rsqrt %143 : vector<8x1xf32>
    %145 = vector.broadcast %144 : vector<8x1xf32> to vector<8x32xf32>
    %146 = arith.mulf %141, %145 : vector<8x32xf32>
    %147 = vector.broadcast %126 : vector<1x32xf32> to vector<8x32xf32>
    %148 = arith.mulf %146, %147 : vector<8x32xf32>
    %149 = vector.broadcast %128 : vector<1x32xf32> to vector<8x32xf32>
    %150 = arith.addf %148, %149 : vector<8x32xf32>
    %151 = arith.truncf %150 : vector<8x32xf32> to vector<8x32xbf16>
    %c0_50 = arith.constant 0 : index
    %c0_51 = arith.constant 0 : index
    %c0_52 = arith.constant 0 : index
    %152 = vector.load %arg9[%c0_50, %c0_51, %c0_52] : memref<1x32x128xbf16, #tpu.memory_space<vmem>>, vector<1x32x128xbf16>
    %153 = vector.shape_cast %152 : vector<1x32x128xbf16> to vector<32x128xbf16>
    %cst_53 = arith.constant dense<0.000000e+00> : vector<8x128xf32>
    %154 = tpu.matmul %151, %153, %cst_53 {dimension_numbers = #tpu.dot_dimension_numbers<[1], [0], [0], [1], [0, 0, 1, 1], [], []>} : vector<8x32xbf16>, vector<32x128xbf16>, vector<8x128xf32> -> vector<8x128xf32>
    %c0_54 = arith.constant 0 : index
    %c0_55 = arith.constant 0 : index
    %c0_56 = arith.constant 0 : index
    %155 = vector.load %arg10[%c0_54, %c0_55, %c0_56] : memref<1x1x128xf32, #tpu.memory_space<vmem>>, vector<1x1x128xf32>
    %156 = vector.shape_cast %155 : vector<1x1x128xf32> to vector<1x128xf32>
    %157 = vector.broadcast %156 : vector<1x128xf32> to vector<8x128xf32>
    %158 = arith.addf %154, %157 : vector<8x128xf32>
    %cst_57 = arith.constant 5.000000e-01 : f32
    %159 = vector.broadcast %cst_57 : f32 to vector<8x128xf32>
    %160 = arith.mulf %159, %158 : vector<8x128xf32>
    %cst_58 = arith.constant 0.707106769 : f32
    %161 = vector.broadcast %cst_58 : f32 to vector<8x128xf32>
    %162 = arith.mulf %158, %161 : vector<8x128xf32>
    %163 = math.erf %162 : vector<8x128xf32>
    %cst_59 = arith.constant 1.000000e+00 : f32
    %164 = vector.broadcast %cst_59 : f32 to vector<8x128xf32>
    %165 = arith.addf %164, %163 : vector<8x128xf32>
    %166 = arith.mulf %160, %165 : vector<8x128xf32>
    %167 = arith.truncf %166 : vector<8x128xf32> to vector<8x128xbf16>
    %c0_60 = arith.constant 0 : index
    %c0_61 = arith.constant 0 : index
    %c0_62 = arith.constant 0 : index
    %168 = vector.load %arg11[%c0_60, %c0_61, %c0_62] : memref<1x128x32xbf16, #tpu.memory_space<vmem>>, vector<1x128x32xbf16>
    %169 = vector.shape_cast %168 : vector<1x128x32xbf16> to vector<128x32xbf16>
    %cst_63 = arith.constant dense<0.000000e+00> : vector<8x32xf32>
    %170 = tpu.matmul %167, %169, %cst_63 {dimension_numbers = #tpu.dot_dimension_numbers<[1], [0], [0], [1], [0, 0, 1, 1], [], []>} : vector<8x128xbf16>, vector<128x32xbf16>, vector<8x32xf32> -> vector<8x32xf32>
    %c0_64 = arith.constant 0 : index
    %c0_65 = arith.constant 0 : index
    %c0_66 = arith.constant 0 : index
    %171 = vector.load %arg12[%c0_64, %c0_65, %c0_66] : memref<1x1x32xf32, #tpu.memory_space<vmem>>, vector<1x1x32xf32>
    %172 = vector.shape_cast %171 : vector<1x1x32xf32> to vector<1x32xf32>
    %173 = vector.broadcast %172 : vector<1x32xf32> to vector<8x32xf32>
    %174 = arith.addf %170, %173 : vector<8x32xf32>
    %175 = arith.addf %150, %174 : vector<8x32xf32>
    %c0_67 = arith.constant 0 : index
    %c0_68 = arith.constant 0 : index
    %c0_69 = arith.constant 0 : index
    %176 = vector.load %arg13[%c0_67, %c0_68, %c0_69] : memref<1x1x32xf32, #tpu.memory_space<vmem>>, vector<1x1x32xf32>
    %177 = vector.shape_cast %176 : vector<1x1x32xf32> to vector<1x32xf32>
    %c0_70 = arith.constant 0 : index
    %c0_71 = arith.constant 0 : index
    %c0_72 = arith.constant 0 : index
    %178 = vector.load %arg14[%c0_70, %c0_71, %c0_72] : memref<1x1x32xf32, #tpu.memory_space<vmem>>, vector<1x1x32xf32>
    %179 = vector.shape_cast %178 : vector<1x1x32xf32> to vector<1x32xf32>
    %cst_73 = arith.constant dense<0.000000e+00> : vector<8xf32>
    %180 = vector.multi_reduction <add>, %175, %cst_73 [1] : vector<8x32xf32> to vector<8xf32>
    %181 = vector.shape_cast %180 : vector<8xf32> to vector<8x1xf32>
    %cst_74 = arith.constant 3.200000e+01 : f32
    %182 = vector.broadcast %cst_74 : f32 to vector<8x1xf32>
    %183 = arith.divf %181, %182 : vector<8x1xf32>
    %184 = vector.broadcast %183 : vector<8x1xf32> to vector<8x32xf32>
    %185 = arith.subf %175, %184 : vector<8x32xf32>
    %186 = arith.mulf %185, %185 : vector<8x32xf32>
    %cst_75 = arith.constant dense<0.000000e+00> : vector<8xf32>
    %187 = vector.multi_reduction <add>, %186, %cst_75 [1] : vector<8x32xf32> to vector<8xf32>
    %188 = vector.shape_cast %187 : vector<8xf32> to vector<8x1xf32>
    %cst_76 = arith.constant 3.200000e+01 : f32
    %189 = vector.broadcast %cst_76 : f32 to vector<8x1xf32>
    %190 = arith.divf %188, %189 : vector<8x1xf32>
    %191 = vector.broadcast %183 : vector<8x1xf32> to vector<8x32xf32>
    %192 = arith.subf %175, %191 : vector<8x32xf32>
    %cst_77 = arith.constant 9.99999974E-6 : f32
    %193 = vector.broadcast %cst_77 : f32 to vector<8x1xf32>
    %194 = arith.addf %190, %193 : vector<8x1xf32>
    %195 = math.rsqrt %194 : vector<8x1xf32>
    %196 = vector.broadcast %195 : vector<8x1xf32> to vector<8x32xf32>
    %197 = arith.mulf %192, %196 : vector<8x32xf32>
    %198 = vector.broadcast %177 : vector<1x32xf32> to vector<8x32xf32>
    %199 = arith.mulf %197, %198 : vector<8x32xf32>
    %200 = vector.broadcast %179 : vector<1x32xf32> to vector<8x32xf32>
    %201 = arith.addf %199, %200 : vector<8x32xf32>
    %c0_78 = arith.constant 0 : index
    %c0_79 = arith.constant 0 : index
    %202 = vector.load %arg15[%c0_78, %c0_79] : memref<8x32xf32, #tpu.memory_space<vmem>>, vector<8x32xf32>
    tpu.vector_store %arg15[%c0_78, %c0_79], %201 {strides = array<i32>} : memref<8x32xf32, #tpu.memory_space<vmem>>, vector<8x32xf32>,
    return
  }
  func.func @transform_0(%arg0: i32, %arg1: i32) -> (i32, i32) {
    %c0_i32 = arith.constant 0 : i32
    %c0_i32_0 = arith.constant 0 : i32
    return %arg0, %c0_i32 : i32, i32
  }
  func.func @transform_1(%arg0: i32, %arg1: i32) -> (i32, i32, i32) {
    %c0_i32 = arith.constant 0 : i32
    %c0_i32_0 = arith.constant 0 : i32
    %c0_i32_1 = arith.constant 0 : i32
    return %arg1, %c0_i32, %c0_i32_0 : i32, i32, i32
  }
  func.func @transform_2(%arg0: i32, %arg1: i32) -> (i32, i32, i32) {
    %c0_i32 = arith.constant 0 : i32
    %c0_i32_0 = arith.constant 0 : i32
    %c0_i32_1 = arith.constant 0 : i32
    return %arg1, %c0_i32, %c0_i32_0 : i32, i32, i32
  }
  func.func @transform_3(%arg0: i32, %arg1: i32) -> (i32, i32, i32) {
    %c0_i32 = arith.constant 0 : i32
    %c0_i32_0 = arith.constant 0 : i32
    %c0_i32_1 = arith.constant 0 : i32
    return %arg1, %c0_i32, %c0_i32_0 : i32, i32, i32
  }
  func.func @transform_4(%arg0: i32, %arg1: i32) -> (i32, i32, i32) {
    %c0_i32 = arith.constant 0 : i32
    %c0_i32_0 = arith.constant 0 : i32
    %c0_i32_1 = arith.constant 0 : i32
    return %arg1, %c0_i32, %c0_i32_0 : i32, i32, i32
  }
  func.func @transform_5(%arg0: i32, %arg1: i32) -> (i32, i32, i32) {
    %c0_i32 = arith.constant 0 : i32
    %c0_i32_0 = arith.constant 0 : i32
    %c0_i32_1 = arith.constant 0 : i32
    return %arg1, %c0_i32, %c0_i32_0 : i32, i32, i32
  }
  func.func @transform_6(%arg0: i32, %arg1: i32) -> (i32, i32, i32) {
    %c0_i32 = arith.constant 0 : i32
    %c0_i32_0 = arith.constant 0 : i32
    %c0_i32_1 = arith.constant 0 : i32
    return %arg1, %c0_i32, %c0_i32_0 : i32, i32, i32
  }
  func.func @transform_7(%arg0: i32, %arg1: i32) -> (i32, i32, i32) {
    %c0_i32 = arith.constant 0 : i32
    %c0_i32_0 = arith.constant 0 : i32
    %c0_i32_1 = arith.constant 0 : i32
    return %arg1, %c0_i32, %c0_i32_0 : i32, i32, i32
  }
  func.func @transform_8(%arg0: i32, %arg1: i32) -> (i32, i32, i32) {
    %c0_i32 = arith.constant 0 : i32
    %c0_i32_0 = arith.constant 0 : i32
    %c0_i32_1 = arith.constant 0 : i32
    return %arg1, %c0_i32, %c0_i32_0 : i32, i32, i32
  }
  func.func @transform_9(%arg0: i32, %arg1: i32) -> (i32, i32, i32) {
    %c0_i32 = arith.constant 0 : i32
    %c0_i32_0 = arith.constant 0 : i32
    %c0_i32_1 = arith.constant 0 : i32
    return %arg1, %c0_i32, %c0_i32_0 : i32, i32, i32
  }
  func.func @transform_10(%arg0: i32, %arg1: i32) -> (i32, i32, i32) {
    %c0_i32 = arith.constant 0 : i32
    %c0_i32_0 = arith.constant 0 : i32
    %c0_i32_1 = arith.constant 0 : i32
    return %arg1, %c0_i32, %c0_i32_0 : i32, i32, i32
  }
  func.func @transform_11(%arg0: i32, %arg1: i32) -> (i32, i32, i32) {
    %c0_i32 = arith.constant 0 : i32
    %c0_i32_0 = arith.constant 0 : i32
    %c0_i32_1 = arith.constant 0 : i32
    return %arg1, %c0_i32, %c0_i32_0 : i32, i32, i32
  }
  func.func @transform_12(%arg0: i32, %arg1: i32) -> (i32, i32, i32) {
    %c0_i32 = arith.constant 0 : i32
    %c0_i32_0 = arith.constant 0 : i32
    %c0_i32_1 = arith.constant 0 : i32
    return %arg1, %c0_i32, %c0_i32_0 : i32, i32, i32
  }
  func.func @transform_13(%arg0: i32, %arg1: i32) -> (i32, i32) {
    %c0_i32 = arith.constant 0 : i32
    %c0_i32_0 = arith.constant 0 : i32
    return %arg0, %c0_i32 : i32, i32
  }
}

</mosaic_0001>

<bundles_post_ra>
// kernel: tpu_custom_call.1
= control target key start
LH: loop header
LB: loop body
LE: loop exit
PB: predicated region body
PF: predicated region fallthrough
CT: control target
= control target key end

     0   :  { %s2674_s0 = inlined_call_operand.vmem [shape: f32[16,32], index: 0, kind: input, shape index: {}]   ;;  %s2675_s1 = inlined_call_operand.vmem [shape: bf16[2,32,96], index: 1, kind: input, shape index: {}]   ;;  %s2676_s2 = inlined_call_operand.vmem [shape: f32[2,1,96], index: 2, kind: input, shape index: {}]   ;;  %s2677_s3 = inlined_call_operand.vmem [shape: bf16[2,32,32], index: 3, kind: input, shape index: {}]   ;;  %s2678_s4 = inlined_call_operand.vmem [shape: f32[2,1,32], index: 4, kind: input, shape index: {}]   ;;  %s2679_s5 = inlined_call_operand.vmem [shape: f32[2,1,32], index: 5, kind: input, shape index: {}]   ;;  %s2680_s6 = inlined_call_operand.vmem [shape: f32[2,1,32], index: 6, kind: input, shape index: {}]   ;;  %s2681_s7 = inlined_call_operand.vmem [shape: bf16[2,32,128], index: 7, kind: input, shape index: {}]   ;;  %s2682_s8 = inlined_call_operand.vmem [shape: f32[2,1,128], index: 8, kind: input, shape index: {}]   ;;  %s2683_s9 = inlined_call_operand.vmem [shape: bf16[2,128,32], index: 9, kind: input, shape index: {}]   ;;  %s2684_s10 = inlined_call_operand.vmem [shape: f32[2,1,32], index: 10, kind: input, shape index: {}]   ;;  %s2685_s11 = inlined_call_operand.vmem [shape: f32[2,1,32], index: 11, kind: input, shape index: {}]   ;;  %s2686_s12 = inlined_call_operand.vmem [shape: f32[2,1,32], index: 12, kind: input, shape index: {}]   ;;  %s2687_s13 = inlined_call_operand.hbm [shape: f32[16,32], index: 13, kind: output, shape index: {}]  }
   0x1   :  { %2703 = sst [smem:[#allocation18_spill]] %s2674_s0 }
   0x2   :  { %2704 = sst [smem:[#allocation19_spill]] %s2675_s1 }
   0x3   :  { %2705 = sst [smem:[#allocation20_spill]] %s2677_s3 }
   0x4   :  { %2706 = sst [smem:[#allocation21_spill]] %s2681_s7 }
   0x5   :  { %2707 = sst [smem:[#allocation22_spill]] %s2686_s12 }
   0x6   :  { %2708 = sst [smem:[#allocation23_spill]] %s2687_s13 }
   0x7   :  { %18 = vsyncpa [#allocation3], 0 }
   0x8   :  { %20 = vsyncpa [#allocation3 + $0x1], 0  ;;  %s2316_s25 = smov 0   ;;  %s2318_s26 = smov 0  }
   0x9   :  { %s2320_s27 = smov 0   ;;  %s2322_s28 = smov 0  }
   0xa   :  { %s2324_s29 = smov 0   ;;  %s2326_s30 = smov 0  }
   0xb   :  { %s2328_s14 = smov 0   ;;  %s2330_s15 = smov 0  }
   0xc LB: > { %2709 = sst [smem:[#allocation5_spill]] %s2202_s25  ;;  %s1815_s16 = sadd.s32 4294967295, %s2230_s15   ;;  %s2230_s15 = sphi %s2330_s15, %s26_s15   ;;  %s2226_s14 = sphi %s2328_s14, %s2749_s14   ;;  %s2222_s30 = sphi %s2326_s30, %s2748_s30   ;;  %s2218_s29 = sphi %s2324_s29, %s2747_s29   ;;  %s2214_s28 = sphi %s2322_s28, %s2746_s28   ;;  %s2210_s27 = sphi %s2320_s27, %s2745_s27   ;;  %s2206_s26 = sphi %s2318_s26, %s2744_s26   ;;  %s2202_s25 = sphi %s2316_s25, %s2743_s25  }
   0xd   : > { %2710 = sst [smem:[#allocation6_spill]] %s2206_s26  ;;  %s1816_s17 = sadd.s32 4294967294, %s2230_s15  }
   0xe   : > { %2711 = sst [smem:[#allocation7_spill]] %s2210_s27  ;;  %s35_s18 = sadd.s32 1, %s2222_s30 }
   0xf   : > { %2712 = sst [smem:[#allocation8_spill]] %s2214_s28  ;;  %p36_p0 = scmp.ge.s32.totalorder %s35_s18, 2 }
  0x10   : > { %2713 = sst [smem:[#allocation9_spill]] %s2218_s29  ;;  %s38_s19 = sadd.s32 1, %s2226_s14 }
  0x11   : > { %2714 = sst [smem:[#allocation10_spill]] %s2222_s30  ;;  %p393_p1 = scmp.ne.s32.totalorder %s2210_s27, %s2206_s26 }
  0x12   : > { %2715 = sst [smem:[#allocation11_spill]] %s2226_s14  ;;  %p394_p2 = scmp.eq.s32.totalorder %s1815_s16, 3 }
  0x13   : > { %2716 = sst [smem:[#allocation12_spill]] %s2230_s15  ;;  %s2751_s18 = smov (%p36_p0, %s35_s18), 0 }
  0x14   : > { %2717 = sst [smem:[#allocation13_spill]] %s2751_s18  ;;  %s2753_s19 = smov (!%p36_p0, %s38_s19), %s2226_s14 }
  0x15   : > { %p2365_p3 = por %p394_p2, %p393_p1  ;;  %p399_p4 = scmp.ne.s32.totalorder %s2206_s26, %s2202_s25 }
  0x16   : > { %p40_p5 = scmp.ge.s32.totalorder %s2753_s19, 2  ;;  %p400_p6 = scmp.eq.s32.totalorder %s1816_s17, 3 }
  0x17   : > { %s2718_s20 = scalar_select %p2365_p3, 1, 0 }
  0x18   : > { %p1819_p7 = scmp.ge.s32.totalorder %s2230_s15, 1  ;;  %p505_p8 = scmp.lt.s32.totalorder %s2230_s15, 5 }
  0x19   : > { %2719 = sst [smem:[#allocation14_spill]] %s2718_s20  ;;  %s2755_s19 = smov (%p40_p5, %s2753_s19), 0 }
  0x1a   : > { %2720 = sst [smem:[#allocation15_spill]] %s2755_s19  ;;  %p2375_p9 = por %p400_p6, %p399_p4 }
  0x1b   : > { %p506_p10 = pnand %p1819_p7, %p505_p8  ;;  %s380_s22 = ssub.s32 %s2226_s14, %s2755_s19 }
  0x1c   : > { %s2721_s21 = scalar_select %p2375_p9, 1, 0 }
  0x1d   : > { %s383_s23 = sadd.s32 1, %s2210_s27  ;;  %p381_p11 = scmp.eq.s32.totalorder %s380_s22, 0 }
  0x1e   : > { %2722 = sst [smem:[#allocation16_spill]] %s2721_s21  ;;  %509 = sbr.rel (%p506_p10) target bundleno = 4080 (0xff0), region = 72 }
  0x1f   : > { %s2383_s24 = scalar_select %p381_p11, %s2210_s27, %s383_s23  }
  0x20   : > { %s2691_s16 = sand.u32 (!%p506_p10), 1, %s2206_s26   ;;  %p592_p12 = scmp.lt.s32.totalorder (!%p506_p10), %s2218_s29, 1 }
  0x21   : > { %2723 = sst [smem:[#allocation17_spill]] %s2383_s24  ;;  %s1820_s17 = sshll.u32 (!%p506_p10), %s2691_s16, 3 }
  0x22   : > { %p596_p13 = scmp.lt.s32.totalorder (!%p506_p10), %s2214_s28, 1  ;;  %s2724_s0 = sld [smem:[#allocation18_spill]] (!%p506_p10) }
  0x23   : > { %s593_s18 = scalar_select %p592_p12, %s2218_s29, 1 }
  0x24   : > { %s2392_s30 = scalar_select %p596_p13, %s2214_s28, 1 }
  0x25   : > { %s1821_s22 = sshll.u32 %s593_s18, 3  ;;  %s2725_s1 = sld [smem:[#allocation19_spill]] }
  0x26   : > { %s1869_s16 = sshll.u32 %s2392_s30, 4  ;;  %s2726_s3 = sld [smem:[#allocation20_spill]] }
  0x27   : > { %s2727_s7 = sld [smem:[#allocation21_spill]]  ;;  %s625_s13 = scalar_lea.vmem %s2682_s8, %s2392_s30 }
  0x28   : > { %s595_s14 = scalar_lea.vmem %s2724_s0, %s1821_s22  ;;  %s633_s12 = scalar_lea.vmem %s2684_s10, %s2392_s30 }
  0x29   : > { %s2728_s24 = sld [smem:[#allocation22_spill]]  ;;  %s2449_s26 = scalar_lea.vmem [#allocation2], %s1820_s17 }
  0x2a   : > { %s2729_s20 = sld [smem:[#allocation8_spill]] }
  0x2b   : > { %s600_s21 = scalar_lea.vmem %s2725_s1, %s1869_s16  ;;  %s636_s1 = scalar_lea.vmem %s2685_s11, %s2392_s30 }
  0x2c   : > { %s2408_s29 = scalar_lea.vmem %s2726_s3, %s1869_s16  ;;  %s1872_s3 = sshll.u32 %s2392_s30, 6 }
  0x2d   : > { %s2425_s15 = scalar_lea.vmem %s2727_s7, %s1869_s16  ;;  %s2439_s23 = scalar_lea.vmem %s2683_s9, %s1872_s3 }
  0x2f   : > { %s639_s7 = scalar_lea.vmem %s2728_s24, %s2392_s30 }
  0x30   : > { %p1830_p0 = scmp.ne.s32.totalorder %s2729_s20, 0 }
  0x32   : > { %644 = sbr.rel (%p1830_p0) target bundleno = 57 (0x39), region = 76 }
  0x37   : > { %v645_v0 = vld [vmem:[%s595_s14] sm:$0xff]  ;;  %vm646_vm0 = vcmask 261120  }
  0x38   : > { %647 = vst.msk [vmem:[%s2449_s26] sm:$0xff] %vm646_vm0, %v645_v0 }
  0x39 PF: > { %v2104_v1 = vld [vmem:[%s600_s21 + $0x8] sm:$0xff]   ;;  %v2232_v2 = vmov 0.0   ;;  %v2105_v3 = vld [vmem:[%s600_s21] sm:$0xff]   ;;  %vm2233_vm1 = vmmov 0   ;;  %vm673_vm2 = vcmask 261120   ;;  %s2730_s21 = scalar_lea.vmem %s2676_s2, %s2392_s30  ;;  %s2234_s17 = smov 64  }
  0x3a   : > { %1912 = vmatprep.subr.bf16.mxu1 %v2232_v2  ;;  %1938 = vmatprep.subr.bf16.mxu0 %v2232_v2  ;;  %v1831_v6 = vld [vmem:[%s2730_s21] ss:$0 sm:$0xff]  ;;  %s2235_s24 = smov 96   ;;  %vm725_vm3 = vcmask 64512   ;;  %vm790_vm4 = vcmask 1043456   ;;  %s2236_s28 = smov 88  }
  0x3b   : > { %1913 = vmatpush3.bf16.msra.mxu1 %v2104_v1  ;;  %1916 = vmatprep.mubr.msk.bf16.mxu1 %vm2233_vm1, %v2232_v2  ;;  %s2237_s18 = smov 120   ;;  %s2238_s19 = smov 56   ;;  %v719_v50 = vld [vmem:[%s2408_s29 + $0x4] sm:$0xf]  ;;  %v718_v56 = vld [vmem:[%s2408_s29] sm:$0xf] }
  0x3c   : > { %1914 = vmatprep.subr.bf16.mxu1 %v2232_v2  ;;  %1940 = vmatprep.mubr.msk.bf16.mxu0 %vm2233_vm1, %v2232_v2  ;;  %s2239_s22 = smov 80   ;;  %s2240_s0 = smov 112   ;;  %v951_v51 = vsel %vm790_vm4, %v719_v50, 0  ;;  %v997_v59 = vsel %vm790_vm4, %v718_v56, 0 }
  0x3d   : > { %s2241_s27 = smov 48   ;;  %s2242_s16 = smov 72  }
  0x3e   : > { %s2243_s25 = smov 104   ;;  %s2244_s20 = smov 40  }
  0x3f   : > { %v2458_v4 = vld [vmem:[%s2449_s26] sm:$0xff]  ;;  %1915 = vmatpush3.bf16.msra.mxu1 %v2105_v3  ;;  %s2731_s14 = scalar_lea.vmem %s2678_s4, %s2392_s30 }
  0x40   : > { %v649_v5 = vpack.c.bf16 %v2458_v4, %v2458_v4  ;;  %1920 = vmatprep.subr.bf16.mxu1 %v2232_v2 }
  0x42   : > { %1917 = vmatmul.mubr.msk.bf16.vlgmr.msra.gmra.mxu1 %vm673_vm2, %v649_v5 }
  0x43   : > { %1922 = vmatprep.mubr.msk.bf16.mxu1 %vm2233_vm1, %v2232_v2 }
 0x102   : > { %v711_v7 = vpop.f32.mrf.mxu1 }
 0x103   : > { %v712_v8 = vadd.f32 %v1831_v6, %v711_v7 }
 0x104   : > { %v1918_v9 = vpop.f32.mrf.mxu1 }
 0x105   : > { %v2474_v10 = vpack.c.bf16 %v712_v8, %v712_v8 }
 0x106   : > { %v714_v11 = vpop.f32.mrf.mxu1 }
 0x107   : > { %785 = vrot.lane.b32.xlu1 %v2474_v10, %s2234_s17  ;;  %723 = vrot.lane.b32.xlu0 %v2474_v10, %s2235_s24  ;;  %s2732_s17 = scalar_lea.vmem %s2679_s5, %s2392_s30  ;;  %s2738_s24 = sld [smem:[#allocation23_spill]] }
 0x108   : > { %v1919_v12 = vpop.f32.mrf.mxu1 }
 0x179   : > { %v724_v13 = vpop.permute.xlu0 %723  ;;  %v786_v15 = vpop.permute.xlu1 %785 }
 0x17a   : > { %v730_v14 = vsel %vm725_vm3, %v724_v13, 0  ;;  %v792_v16 = vsel %vm790_vm4, %v786_v15, 0 }
 0x17b   : > { %1921 = vmatpush3.bf16.xpose.msra.mxu1 %v730_v14 }
 0x17c   : > { %1926 = vmatprep.subr.bf16.mxu1 %v2232_v2 }
 0x182   : > { %1923 = vmatmul.mubr.msk.bf16.vlgmr.msra.gmra.mxu1 %vm725_vm3, %v2474_v10 }
 0x183   : > { %1927 = vmatpush3.bf16.msra.mxu1 %v792_v16  ;;  %1928 = vmatprep.mubr.msk.bf16.mxu1 %vm2233_vm1, %v2232_v2 }
 0x184   : > { %1932 = vmatprep.subr.bf16.mxu1 %v2232_v2 }
 0x242   : > { %v766_v17 = vpop.f32.mrf.mxu1 }
 0x243   : > { %v772_v18 = vmul.f32 0.35355338, %v766_v17 }
 0x244   : > { %v1924_v19 = vpop.f32.mrf.mxu1 }
 0x245   : > { %v773_v20 = vsel %vm725_vm3, %v772_v18, -inf }
 0x246   : > { %774 = vmax.xlane.f32.xlu0 %v773_v20  ;;  %v769_v21 = vpop.f32.mrf.mxu1 }
 0x248   : > { %v1925_v22 = vpop.f32.mrf.mxu1 }
 0x2cf   : > { %v775_v23 = vpop.xlane.xlu0 %774 }
 0x2d0   : > { %v776_v24 = vsub.f32 %v772_v18, %v775_v23 }
 0x2d2   : > { %v777_v25 = vmul.f32 1.442695, %v776_v24 }
 0x2d4   : > { %2116 = vpow2.f32 %v777_v25 }
 0x2e1   : > { %v2117_v26 = vpop.eup %2116 }
 0x2e2   : > { %v779_v27 = vsel %vm725_vm3, %v2117_v26, 0.0 }
 0x2e3   : > { %780 = vadd.xlane.f32.xlu1 %v779_v27 }
 0x2f4   : > { %837 = vrot.lane.b32.xlu1 %v2474_v10, %s2236_s28 }
 0x2f8   : > { %835 = vrot.lane.b32.xlu1 %v2474_v10, %s2237_s18  ;;  %s2733_s18 = scalar_lea.vmem %s2680_s6, %s2392_s30  ;;  %s2245_s30 = smov [#allocation2]  }
 0x36c   : > { %v781_v28 = vpop.xlane.xlu1 %780 }
 0x36d   : > { %2118 = vrcp.f32 %v781_v28 }
 0x370   : > { %v838_v31 = vpop.permute.xlu1 %837 }
 0x371   : > { %v843_v33 = vsel %vm725_vm3, %v838_v31, 0 }
 0x374   : > { %v836_v34 = vpop.permute.xlu1 %835 }
 0x37a   : > { %v2119_v29 = vpop.eup %2118 }
 0x37b   : > { %v783_v30 = vmul.f32 %v2119_v29, %v2117_v26 }
 0x37d   : > { %v784_v32 = vpack.c.bf16 %v783_v30, %v783_v30 }
 0x37f   : > { %1929 = vmatmul.mubr.msk.bf16.vlgmr.msra.gmra.mxu1 %vm725_vm3, %v784_v32 }
 0x380   : > { %1933 = vmatpush3.bf16.xpose.msra.mxu1 %v843_v33  ;;  %1934 = vmatprep.mubr.msk.bf16.mxu1 %vm2233_vm1, %v2232_v2 }
 0x381   : > { %1944 = vmatprep.subr.bf16.mxu1 %v2232_v2 }
 0x387   : > { %1935 = vmatmul.mubr.msk.bf16.vlgmr.msra.gmra.mxu1 %vm725_vm3, %v836_v34 }
 0x388   : > { %1946 = vmatprep.mubr.msk.bf16.mxu1 %vm2233_vm1, %v2232_v2  ;;  %1945 = vmatpush3.bf16.msra.mxu1 %v951_v51 }
 0x389   : > { %1956 = vmatprep.subr.bf16.mxu1 %v2232_v2 }
 0x43f   : > { %v828_v35 = vpop.f32.mrf.mxu1 }
 0x440   : > { %v834_v60 = vpack.c.bf16 %v828_v35, %v828_v35 }
 0x441   : > { %v1930_v36 = vpop.f32.mrf.mxu1 }
 0x442   : > { %v720_v36 = vld [vmem:[%s2408_s29 + $0x8] sm:$0xf] }
 0x443   : > { %v831_v37 = vpop.f32.mrf.mxu1 }
 0x444   : > { %v1155_v37 = vsel %vm790_vm4, %v720_v36, 0 }
 0x445   : > { %v1931_v38 = vpop.f32.mrf.mxu1 }
 0x447   : > { %v879_v39 = vpop.f32.mrf.mxu1 }
 0x448   : > { %v885_v40 = vmul.f32 0.35355338, %v879_v39 }
 0x449   : > { %v1936_v41 = vpop.f32.mrf.mxu1 }
 0x44a   : > { %v886_v42 = vsel %vm725_vm3, %v885_v40, -inf }
 0x44b   : > { %887 = vmax.xlane.f32.xlu1 %v886_v42  ;;  %v882_v43 = vpop.f32.mrf.mxu1 }
 0x44d   : > { %v1937_v44 = vpop.f32.mrf.mxu1 }
 0x4d4   : > { %v888_v45 = vpop.xlane.xlu1 %887 }
 0x4d5   : > { %v889_v46 = vsub.f32 %v885_v40, %v888_v45 }
 0x4d7   : > { %v890_v47 = vmul.f32 1.442695, %v889_v46 }
 0x4d9   : > { %2120 = vpow2.f32 %v890_v47 }
 0x4e6   : > { %v2121_v48 = vpop.eup %2120 }
 0x4e7   : > { %v892_v49 = vsel %vm725_vm3, %v2121_v48, 0.0 }
 0x4e8   : > { %893 = vadd.xlane.f32.xlu0 %v892_v49 }
 0x4fe   : > { %898 = vrot.lane.b32.xlu0 %v2474_v10, %s2238_s19 }
 0x502   : > { %1041 = vrot.lane.b32.xlu0 %v2474_v10, %s2239_s22 }
 0x506   : > { %1039 = vrot.lane.b32.xlu0 %v2474_v10, %s2240_s0 }
 0x571   : > { %v894_v52 = vpop.xlane.xlu0 %893 }
 0x572   : > { %2122 = vrcp.f32 %v894_v52 }
 0x575   : > { %v899_v53 = vpop.permute.xlu0 %898 }
 0x576   : > { %v904_v54 = vsel %vm790_vm4, %v899_v53, 0 }
 0x577   : > { %1939 = vmatpush3.bf16.msra.mxu0 %v904_v54 }
 0x578   : > { %1950 = vmatprep.subr.bf16.mxu0 %v2232_v2 }
 0x579   : > { %v1042_v61 = vpop.permute.xlu0 %1041 }
 0x57a   : > { %v1047_v1 = vsel %vm725_vm3, %v1042_v61, 0 }
 0x57d   : > { %v1040_v7 = vpop.permute.xlu0 %1039 }
 0x57f   : > { %v2123_v55 = vpop.eup %2122 }
 0x580   : > { %v896_v57 = vmul.f32 %v2123_v55, %v2121_v48 }
 0x582   : > { %v897_v58 = vpack.c.bf16 %v896_v57, %v896_v57 }
 0x584   : > { %1941 = vmatmul.mubr.msk.bf16.vlgmr.msra.gmra.mxu0 %vm725_vm3, %v897_v58  ;;  %v721_v58 = vld [vmem:[%s2408_s29 + $0xc] sm:$0xf] }
 0x585   : > { %1951 = vmatpush3.bf16.msra.mxu0 %v997_v59  ;;  %1952 = vmatprep.mubr.msk.bf16.mxu0 %vm2233_vm1, %v2232_v2  ;;  %v1314_v59 = vsel %vm790_vm4, %v721_v58, 0 }
 0x586   : > { %1962 = vmatprep.subr.bf16.mxu0 %v2232_v2 }
 0x58c   : > { %1953 = vmatmul.mubr.msk.bf16.vlgmr.msra.gmra.mxu0 %vm725_vm3, %v834_v60 }
 0x58d   : > { %1964 = vmatprep.mubr.msk.bf16.mxu0 %vm2233_vm1, %v2232_v2 }
 0x644   : > { %v940_v62 = vpop.f32.mrf.mxu0 }
 0x645   : > { %v946_v63 = vpack.c.bf16 %v940_v62, %v940_v62 }
 0x646   : > { %v1942_v0 = vpop.f32.mrf.mxu0 }
 0x647   : > { %1947 = vmatmul.mubr.msk.bf16.vlgmr.msra.gmra.mxu1 %vm725_vm3, %v946_v63 }
 0x648   : > { %1957 = vmatpush3.bf16.xpose.msra.mxu1 %v1047_v1  ;;  %v943_v3 = vpop.f32.mrf.mxu0  ;;  %1958 = vmatprep.mubr.msk.bf16.mxu1 %vm2233_vm1, %v2232_v2 }
 0x649   : > { %1968 = vmatprep.subr.bf16.mxu1 %v2232_v2 }
 0x64a   : > { %v1943_v5 = vpop.f32.mrf.mxu0 }
 0x64c   : > { %v2522_v6 = vpop.f32.mrf.mxu0 }
 0x64e   : > { %v1954_v8 = vpop.f32.mrf.mxu0 }
 0x64f   : > { %1959 = vmatmul.mubr.msk.bf16.vlgmr.msra.gmra.mxu1 %vm725_vm3, %v1040_v7 }
 0x650   : > { %v1036_v9 = vpop.f32.mrf.mxu0  ;;  %1970 = vmatprep.mubr.msk.bf16.mxu1 %vm2233_vm1, %v2232_v2  ;;  %1969 = vmatpush3.bf16.msra.mxu1 %v1155_v37 }
 0x651   : > { %1980 = vmatprep.subr.bf16.mxu1 %v2232_v2 }
 0x652   : > { %v1955_v11 = vpop.f32.mrf.mxu0 }
 0x707   : > { %v2527_v12 = vpop.f32.mrf.mxu1 }
 0x708   : > { %v1034_v54 = vadd.f32 %v2522_v6, %v2527_v12  ;;  %v1847_v12 = vld [vmem:[%s2731_s14] ss:$0 sm:$0xff] }
 0x709   : > { %v1948_v13 = vpop.f32.mrf.mxu1 }
 0x70b   : > { %v990_v14 = vpop.f32.mrf.mxu1 }
 0x70d   : > { %v1949_v15 = vpop.f32.mrf.mxu1 }
 0x70f   : > { %v1083_v16 = vpop.f32.mrf.mxu1 }
 0x710   : > { %v1089_v17 = vmul.f32 0.35355338, %v1083_v16 }
 0x711   : > { %v1960_v18 = vpop.f32.mrf.mxu1 }
 0x712   : > { %v1090_v19 = vsel %vm725_vm3, %v1089_v17, -inf }
 0x713   : > { %1091 = vmax.xlane.f32.xlu1 %v1090_v19  ;;  %v1086_v20 = vpop.f32.mrf.mxu1 }
 0x715   : > { %v1961_v21 = vpop.f32.mrf.mxu1 }
 0x724   : > { %1102 = vrot.lane.b32.xlu1 %v2474_v10, %s2241_s27 }
 0x728   : > { %1200 = vrot.lane.b32.xlu1 %v2474_v10, %s2242_s16 }
 0x72c   : > { %1198 = vrot.lane.b32.xlu1 %v2474_v10, %s2243_s25 }
 0x79c   : > { %v1092_v22 = vpop.xlane.xlu1 %1091 }
 0x79d   : > { %v1093_v23 = vsub.f32 %v1089_v17, %v1092_v22 }
 0x79f   : > { %v1094_v24 = vmul.f32 1.442695, %v1093_v23 }
 0x7a0   : > { %v1103_v25 = vpop.permute.xlu1 %1102 }
 0x7a1   : > { %2124 = vpow2.f32 %v1094_v24  ;;  %v1108_v26 = vsel %vm790_vm4, %v1103_v25, 0  ;;  %v2106_v25 = vld [vmem:[%s2425_s15 + $0x8] sm:$0xff]  }
 0x7a2   : > { %1963 = vmatpush3.bf16.msra.mxu0 %v1108_v26  ;;  %v2107_v26 = vld [vmem:[%s2425_s15] sm:$0xff]   ;;  %s1625_s15 = sshll.u32 %s2449_s26, 4  ;;  %s1626_s15 = int_to_ptr.vmem [resolvable:$true] %s1625_s15 }
 0x7a3   : > { %1974 = vmatprep.subr.bf16.mxu0 %v2232_v2 }
 0x7a4   : > { %v1201_v32 = vpop.permute.xlu1 %1200 }
 0x7a5   : > { %v1206_v34 = vsel %vm725_vm3, %v1201_v32, 0  ;;  %v1848_v32 = vld [vmem:[%s2732_s17] ss:$0 sm:$0xff] }
 0x7a8   : > { %v1199_v35 = vpop.permute.xlu1 %1198 }
 0x7ae   : > { %v2125_v27 = vpop.eup %2124 }
 0x7af   : > { %v1096_v28 = vsel %vm725_vm3, %v2125_v27, 0.0 }
 0x7b0   : > { %1097 = vadd.xlane.f32.xlu0 %v1096_v28 }
 0x839   : > { %v1098_v29 = vpop.xlane.xlu0 %1097 }
 0x83a   : > { %2126 = vrcp.f32 %v1098_v29 }
 0x847   : > { %v2127_v30 = vpop.eup %2126 }
 0x848   : > { %v1100_v31 = vmul.f32 %v2127_v30, %v2125_v27  ;;  %v2109_v27 = vld [vmem:[%s2439_s23 + $0x30] sm:$0xff]  }
 0x84a   : > { %v1101_v33 = vpack.c.bf16 %v1100_v31, %v1100_v31 }
 0x84c   : > { %1965 = vmatmul.mubr.msk.bf16.vlgmr.msra.gmra.mxu0 %vm725_vm3, %v1101_v33 }
 0x84d   : > { %1975 = vmatpush3.bf16.xpose.msra.mxu0 %v1206_v34  ;;  %1976 = vmatprep.mubr.msk.bf16.mxu0 %vm2233_vm1, %v2232_v2  ;;  %v1849_v34 = vld [vmem:[%s2733_s18] ss:$0 sm:$0xff] }
 0x84e   : > { %1986 = vmatprep.subr.bf16.mxu0 %v2232_v2 }
 0x854   : > { %1977 = vmatmul.mubr.msk.bf16.vlgmr.msra.gmra.mxu0 %vm725_vm3, %v1199_v35 }
 0x855   : > { %1988 = vmatprep.mubr.msk.bf16.mxu0 %vm2233_vm1, %v2232_v2  ;;  %1987 = vmatpush3.bf16.msra.mxu0 %v1314_v59 }
 0x856   : > { %2000 = vmatprep.subr.bf16.mxu0 %v2232_v2 }
 0x90c   : > { %v1144_v38 = vpop.f32.mrf.mxu0 }
 0x90d   : > { %v1150_v39 = vpack.c.bf16 %v1144_v38, %v1144_v38  ;;  %v2110_v38 = vld [vmem:[%s2439_s23 + $0x28] sm:$0xff]  }
 0x90e   : > { %v1966_v40 = vpop.f32.mrf.mxu0 }
 0x90f   : > { %1971 = vmatmul.mubr.msk.bf16.vlgmr.msra.gmra.mxu1 %vm725_vm3, %v1150_v39  ;;  %v2111_v39 = vld [vmem:[%s2439_s23 + $0x20] sm:$0xff]   ;;  %v2112_v40 = vld [vmem:[%s2439_s23 + $0x18] sm:$0xff]  }
 0x910   : > { %v1147_v41 = vpop.f32.mrf.mxu0  ;;  %1982 = vmatprep.mubr.msk.bf16.mxu1 %vm2233_vm1, %v2232_v2 }
 0x911   : > { %v2113_v41 = vld [vmem:[%s2439_s23 + $0x10] sm:$0xff]  }
 0x912   : > { %v1967_v42 = vpop.f32.mrf.mxu0 }
 0x913   : > { %v2114_v42 = vld [vmem:[%s2439_s23 + $0x8] sm:$0xff]  }
 0x914   : > { %v1242_v43 = vpop.f32.mrf.mxu0 }
 0x915   : > { %v1248_v44 = vmul.f32 0.35355338, %v1242_v43  ;;  %v2115_v43 = vld [vmem:[%s2439_s23] sm:$0xff]  }
 0x916   : > { %v1978_v45 = vpop.f32.mrf.mxu0 }
 0x917   : > { %v1249_v46 = vsel %vm725_vm3, %v1248_v44, -inf }
 0x918   : > { %1250 = vmax.xlane.f32.xlu1 %v1249_v46  ;;  %v1245_v47 = vpop.f32.mrf.mxu0 }
 0x91a   : > { %v1979_v48 = vpop.f32.mrf.mxu0 }
 0x9a1   : > { %v1251_v49 = vpop.xlane.xlu1 %1250 }
 0x9a2   : > { %v1252_v50 = vsub.f32 %v1248_v44, %v1251_v49  ;;  %v1850_v44 = vld [vmem:[%s625_s13] ss:$0 sm:$0xff]  ;;  %s2734_s13 = sld [smem:[#allocation9_spill]] }
 0x9a4   : > { %v1253_v51 = vmul.f32 1.442695, %v1252_v50 }
 0x9a6   : > { %2128 = vpow2.f32 %v1253_v51 }
 0x9a8   : > { %s1866_s14 = sshll.u32 %s2734_s13, 7 }
 0x9a9   : > { %s1623_s28 = scalar_lea.hbm %s2738_s24, %s1866_s14 }
 0x9b3   : > { %v2129_v52 = vpop.eup %2128 }
 0x9b4   : > { %v1255_v53 = vsel %vm725_vm3, %v2129_v52, 0.0 }
 0x9b5   : > { %1256 = vadd.xlane.f32.xlu0 %v1255_v53 }
 0x9cb   : > { %1261 = vrot.lane.b32.xlu0 %v2474_v10, %s2244_s20 }
 0x9cf   : > { %v1191_v55 = vpop.f32.mrf.mxu1 }
 0x9d0   : > { %v1197_v56 = vadd.f32 %v1191_v55, %v1034_v54  ;;  %v1854_v55 = vld [vmem:[%s633_s12] ss:$0 sm:$0xff]  ;;  %s2735_s12 = sld [smem:[#allocation6_spill]] }
 0x9d1   : > { %v1972_v57 = vpop.f32.mrf.mxu1 }
 0x9d3   : > { %v1194_v60 = vpop.f32.mrf.mxu1 }
 0x9d5   : > { %v1973_v61 = vpop.f32.mrf.mxu1 }
 0x9d6   : > { %s2739_s18 = sand.u32 1, %s2735_s12  }
 0x9d7   : > { %s1612_s19 = scalar_lea.sflag [#allocation3], %s2739_s18 }
 0xa3e   : > { %v1257_v62 = vpop.xlane.xlu0 %1256 }
 0xa3f   : > { %2130 = vrcp.f32 %v1257_v62 }
 0xa42   : > { %v1262_v63 = vpop.permute.xlu0 %1261 }
 0xa43   : > { %v1267_v0 = vsel %vm790_vm4, %v1262_v63, 0 }
 0xa44   : > { %1981 = vmatpush3.bf16.msra.mxu1 %v1267_v0 }
 0xa45   : > { %1992 = vmatprep.subr.bf16.mxu1 %v2232_v2 }
 0xa4c   : > { %v2131_v10 = vpop.eup %2130 }
 0xa4d   : > { %v1259_v1 = vmul.f32 %v2131_v10, %v2129_v52 }
 0xa4f   : > { %v1260_v3 = vpack.c.bf16 %v1259_v1, %v1259_v1 }
 0xa51   : > { %1983 = vmatmul.mubr.msk.bf16.vlgmr.msra.gmra.mxu1 %vm725_vm3, %v1260_v3 }
 0xa52   : > { %1996 = vmatprep.mubr.msk.bf16.mxu1 %vm2233_vm1, %v2232_v2  ;;  %1993 = vmatpush3.bf16.msra.mxu1 %v2106_v25 }
 0xa53   : > { %1994 = vmatprep.subr.bf16.mxu1 %v2232_v2 }
 0xa56   : > { %1995 = vmatpush3.bf16.msra.mxu1 %v2107_v26 }
 0xb11   : > { %v1303_v5 = vpop.f32.mrf.mxu1 }
 0xb12   : > { %v1309_v6 = vpack.c.bf16 %v1303_v5, %v1303_v5 }
 0xb13   : > { %v1984_v7 = vpop.f32.mrf.mxu1 }
 0xb14   : > { %1989 = vmatmul.mubr.msk.bf16.vlgmr.msra.gmra.mxu0 %vm725_vm3, %v1309_v6 }
 0xb15   : > { %v1306_v8 = vpop.f32.mrf.mxu1  ;;  %2016 = vmatprep.mubr.msk.bf16.mxu0 %vm2233_vm1, %v2232_v2 }
 0xb17   : > { %v1985_v9 = vpop.f32.mrf.mxu1 }
 0xb18   : > { %v1863_v9 = vld [vmem:[%s636_s1] ss:$0 sm:$0xff]  ;;  %s2138_s1 = scalar_lea.vmem %s1626_s15, 128 }
 0xb19   : > { %p2139_p1 = scmp.ne.s32.totalorder %s1626_s15, %s2138_s1 }
 0xb1b   : > { %p2140_p2 = pnand %p2139_p1, %p2365_p3 }
 0xb1d   : > { %p2141_p4 = pneg %p2140_p2 }
 0xbd4   : > { %v1350_v11 = vpop.f32.mrf.mxu0 }
 0xbd5   : > { %v1356_v13 = vadd.f32 %v1350_v11, %v1197_v56 }
 0xbd6   : > { %v1990_v14 = vpop.f32.mrf.mxu0 }
 0xbd7   : > { %v1364_v15 = vadd.f32 %v1847_v12, %v1356_v13  ;;  %v1864_v12 = vld [vmem:[%s639_s7] ss:$0 sm:$0xff]  ;;  %s2142_s7 = sshll.u32 %s2245_s30, 4  ;;  %s2143_s7 = int_to_ptr.vmem [resolvable:$false] %s2142_s7 }
 0xbd8   : > { %v1353_v16 = vpop.f32.mrf.mxu0  ;;  %s2144_s22 = scalar_lea.vmem %s2143_s7, 256  ;;  %p2145_p5 = scmp.lt.s32.totalorder %s1626_s15, %s2143_s7 }
 0xbd9   : > { %v1365_v17 = vadd.f32 %v1364_v15, %v2458_v4  ;;  %v2108_v4 = vld [vmem:[%s2439_s23 + $0x38] sm:$0xff]   ;;  %p2146_p6 = scmp.lt.s32.totalorder %s2144_s22, %s2138_s1 }
 0xbda   : > { %v1991_v18 = vpop.f32.mrf.mxu0  ;;  %2001 = vmatpush3.bf16.msra.mxu0 %v2108_v4 }
 0xbdb   : > { %v1368_v19 = vsel %vm673_vm2, %v1365_v17, 0.0  ;;  %2002 = vmatprep.subr.bf16.mxu0 %v2232_v2  ;;  %p2147_p7 = por %p2146_p6, %p2145_p5 }
 0xbdc   : > { %1369 = vadd.xlane.f32.xlu0 %v1368_v19 }
 0xbdd   : > { %p2148_p8 = pnand %p2147_p7, %p2141_p4 }
 0xbde   : > { %2003 = vmatpush3.bf16.msra.mxu0 %v2109_v27 }
 0xbdf   : > { %2004 = vmatprep.subr.bf16.mxu0 %v2232_v2 }
 0xbe2   : > { %2005 = vmatpush3.bf16.msra.mxu0 %v2110_v38 }
 0xbe3   : > { %2006 = vmatprep.subr.bf16.mxu0 %v2232_v2 }
 0xbe6   : > { %2007 = vmatpush3.bf16.msra.mxu0 %v2111_v39 }
 0xbe7   : > { %2008 = vmatprep.subr.bf16.mxu0 %v2232_v2 }
 0xbea   : > { %2009 = vmatpush3.bf16.msra.mxu0 %v2112_v40 }
 0xbeb   : > { %2010 = vmatprep.subr.bf16.mxu0 %v2232_v2 }
 0xbee   : > { %2011 = vmatpush3.bf16.msra.mxu0 %v2113_v41 }
 0xbef   : > { %2012 = vmatprep.subr.bf16.mxu0 %v2232_v2 }
 0xbf2   : > { %2013 = vmatpush3.bf16.msra.mxu0 %v2114_v42 }
 0xbf3   : > { %2014 = vmatprep.subr.bf16.mxu0 %v2232_v2 }
 0xbf6   : > { %2015 = vmatpush3.bf16.msra.mxu0 %v2115_v43 }
 0xc65   : > { %v1370_v20 = vpop.xlane.xlu0 %1369 }
 0xc66   : > { %v1372_v21 = vmul.f32 0.03125, %v1370_v20 }
 0xc68   : > { %v1373_v22 = vsub.f32 %v1365_v17, %v1372_v21 }
 0xc6a   : > { %v1374_v23 = vmul.f32 %v1373_v22, %v1373_v22 }
 0xc6c   : > { %v1375_v24 = vsel %vm673_vm2, %v1374_v23, 0.0 }
 0xc6d   : > { %1376 = vadd.xlane.f32.xlu1 %v1375_v24 }
 0xcf6   : > { %v1377_v28 = vpop.xlane.xlu1 %1376 }
 0xcf7   : > { %v1378_v29 = vmul.f32 0.03125, %v1377_v28 }
 0xcf9   : > { %v1379_v30 = vadd.f32 1e-05, %v1378_v29 }
 0xcfb   : > { %2132 = vrsqrt.f32 %v1379_v30 }
 0xd08   : > { %v2133_v31 = vpop.eup %2132 }
 0xd09   : > { %v1381_v33 = vmul.f32 %v2133_v31, %v1373_v22 }
 0xd0b   : > { %v1388_v35 = vmul.f32 %v1848_v32, %v1381_v33 }
 0xd0d   : > { %v1395_v36 = vadd.f32 %v1849_v34, %v1388_v35 }
 0xd0f   : > { %v1396_v37 = vpack.c.bf16 %v1395_v36, %v1395_v36 }
 0xd11   : > { %1997 = vmatmul.mubr.msk.bf16.vlgmr.msra.gmra.mxu1 %vm673_vm2, %v1396_v37 }
 0xdd1   : > { %v1457_v45 = vpop.f32.mrf.mxu1 }
 0xdd2   : > { %v1458_v46 = vadd.f32 %v1850_v44, %v1457_v45 }
 0xdd3   : > { %v1998_v47 = vpop.f32.mrf.mxu1 }
 0xdd4   : > { %v1464_v48 = vmul.f32 0.70710677, %v1458_v46  ;;  %v1463_v52 = vmul.f32 0.5, %v1458_v46 }
 0xdd5   : > { %v1460_v49 = vpop.f32.mrf.mxu1 }
 0xdd6   : > { %2134 = verf.f32 %v1464_v48 }
 0xdd7   : > { %v1999_v50 = vpop.f32.mrf.mxu1 }
 0xde3   : > { %v2135_v51 = vpop.eup %2134 }
 0xde4   : > { %v1466_v53 = vadd.f32 1.0, %v2135_v51 }
 0xde6   : > { %v1467_v54 = vmul.f32 %v1466_v53, %v1463_v52 }
 0xde8   : > { %v1468_v2 = vpack.c.bf16 %v1467_v54, %v1467_v54 }
 0xdea   : > { %2017 = vmatmul.mubr.bf16.vlgmr.msra.gmra.mxu0 %v1468_v2 }
 0xeaa   : > { %v1574_v56 = vpop.f32.mrf.mxu0 }
 0xeab   : > { %v1575_v57 = vadd.f32 %v1854_v55, %v1574_v56 }
 0xeac   : > { %v2018_v58 = vpop.f32.mrf.mxu0 }
 0xead   : > { %v1580_v59 = vadd.f32 %v1575_v57, %v1395_v36 }
 0xeae   : > { %v1577_v60 = vpop.f32.mrf.mxu0 }
 0xeaf   : > { %v1583_v61 = vsel %vm673_vm2, %v1580_v59, 0.0 }
 0xeb0   : > { %1584 = vadd.xlane.f32.xlu1 %v1583_v61  ;;  %v2019_v62 = vpop.f32.mrf.mxu0 }
 0xf39   : > { %v1585_v63 = vpop.xlane.xlu1 %1584 }
 0xf3a   : > { %v1586_v0 = vmul.f32 0.03125, %v1585_v63 }
 0xf3c   : > { %v1587_v10 = vsub.f32 %v1580_v59, %v1586_v0 }
 0xf3e   : > { %v1588_v1 = vmul.f32 %v1587_v10, %v1587_v10 }
 0xf40   : > { %v1589_v3 = vsel %vm673_vm2, %v1588_v1, 0.0 }
 0xf41   : > { %1590 = vadd.xlane.f32.xlu1 %v1589_v3 }
 0xfca   : > { %v1591_v5 = vpop.xlane.xlu1 %1590 }
 0xfcb   : > { %v1592_v6 = vmul.f32 0.03125, %v1591_v5 }
 0xfcd   : > { %v1593_v7 = vadd.f32 1e-05, %v1592_v6 }
 0xfcf   : > { %2136 = vrsqrt.f32 %v1593_v7 }
 0xfdc   : > { %v2137_v8 = vpop.eup %2136 }
 0xfdd   : > { %v1595_v11 = vmul.f32 %v2137_v8, %v1587_v10 }
 0xfdf   : > { %v1602_v13 = vmul.f32 %v1863_v9, %v1595_v11 }
 0xfe1   : > { %v1609_v14 = vadd.f32 %v1864_v12, %v1602_v13 }
 0xfe3   : > { %1610 = vst.msk [vmem:[%s2449_s26] sm:$0xff] %vm673_vm2, %v1609_v14 }
 0xfe4   : > { %2151 = shalt.err (!%p2148_p8)
}
 0xfe5   : > { %s2152_s23 = scalar_lea.hbm %s1623_s28, 128  ;;  %s2156_s13 = scalar_lea.hbm %s2738_s24, 256 }
 0xfe6   : > { %p2153_p10 = scmp.ne.s32.totalorder %s1623_s28, %s2152_s23  ;;  %p2157_p13 = scmp.lt.s32.totalorder %s1623_s28, %s2738_s24 }
 0xfe7   : > { %p2158_p0 = scmp.lt.s32.totalorder %s2156_s13, %s2152_s23 }
 0xfe8   : > { %p2154_p11 = pnand %p2153_p10, %p2365_p3 }
 0xfe9   : > { %p2159_p1 = por %p2158_p0, %p2157_p13 }
 0xfea   : > { %p2155_p12 = pneg %p2154_p11 }
 0xfec   : > { %p2160_p2 = pnand %p2159_p1, %p2155_p12 }
 0xfee   : > { %2163 = shalt.err (!%p2160_p2)
}
 0xfef   : > { %2020 = dma.vmem_to_hbm [thread:$0]  (%p2365_p3), %s1626_s15, 128, %s1623_s28, %s1612_s19  }
 0xff0 PF: > { %s2740_s25 = sld [smem:[#allocation12_spill]] }
 0xff1   : > { %s2741_s20 = sld [smem:[#allocation5_spill]] }
 0xff6   : > { %p2026_p4 = scmp.ge.s32.totalorder %s2740_s25, 2 }
 0xff7   : > { %s1637_s3 = sand.u32 1, %s2741_s20  }
 0xff8   : > { %p2023_p5 = pnand %p2026_p4, %p2375_p9  ;;  %s1638_s14 = scalar_lea.sflag [#allocation3], %s1637_s3 }
 0xffa   : > { %p2024_p6 = pneg %p2023_p5 }
 0xffc   : > { %2197 = dma.done.wait (%p2024_p6), %s1638_s14, 128  }
 0xffd   : > { %2199 = vsyncadd (%p2024_p6), %s1638_s14, 4294967168  ;;  %s26_s15 = sadd.s32 1, %s2740_s25   ;;  %s2743_s25 = sld [smem:[#allocation6_spill]] }
 0xffe   : > { %p23_p7 = scmp.ge.s32.totalorder %s26_s15, 6   ;;  %s2744_s26 = sld [smem:[#allocation7_spill]] }
 0xfff   : > { %s2745_s27 = sld [smem:[#allocation17_spill]] }
0x1000   : > { %s2746_s28 = sld [smem:[#allocation10_spill]]  ;;  %25 = sbr.rel (!%p23_p7) target bundleno = 12 (0xc), region = 147 }
0x1001   : > { %s2747_s29 = sld [smem:[#allocation11_spill]] }
0x1002   : > { %s2748_s30 = sld [smem:[#allocation13_spill]] }
0x1003   : > { %s2749_s14 = sld [smem:[#allocation15_spill]] }
0x1005   :  { %1643 = vsyncpa [#allocation3], 1 }
0x1006   :  { %1645 = vsyncpa [#allocation3 + $0x1], 1 }

</bundles_post_ra>
